<compile_context>
chip_gen: v7x
topology: tpu7x:2x2x1
jax: 0.10.0
libtpu: 0.0.40
codegen_flags: <defaults>
</compile_context>

<pallas_src>
import jax
import jax.numpy as jnp
from jax.experimental import pallas as pl
from jax.experimental.pallas import tpu as pltpu


def _embedding_gather_kernel(ids_ref, table_hbm, out_ref, row_buf, copy_sems):
    # ids_ref:   (N_pad,) int32 in SMEM (scalar prefetch)
    # table_hbm: (V, E) in HBM (memory_space=pl.ANY) -- never fully loaded
    # out_ref:   (tokens_per_step, E) VMEM output tile
    # row_buf:   (tokens_per_step, E) VMEM scratch (DMA destination)
    # copy_sems: (tokens_per_step,) DMA semaphores
    g = pl.program_id(0)
    tokens_per_step = out_ref.shape[0]
    base = g * tokens_per_step

    # Issue all row copies first so `tokens_per_step` DMAs are in flight at
    # once (per-row copies are small, so concurrency hides issue latency).
    for r in range(tokens_per_step):
        tok = ids_ref[base + r]
        pltpu.make_async_copy(
            table_hbm.at[pl.ds(tok, 1), :],
            row_buf.at[pl.ds(r, 1), :],
            copy_sems.at[r],
        ).start()

    # Wait for all of them (wait descriptor only needs matching shapes/sem).
    for r in range(tokens_per_step):
        pltpu.make_async_copy(
            table_hbm.at[pl.ds(0, 1), :],
            row_buf.at[pl.ds(r, 1), :],
            copy_sems.at[r],
        ).wait()

    # Single block store of the gathered tile.
    out_ref[...] = row_buf[...]


def embedding_forward(token_ids, table, *, tokens_per_step=8):
    """Pallas equivalent of EmbeddingLayer.forward (nn.Embedding lookup).

    Args:
      token_ids:       int array of shape (B, S).
      table:           float array of shape (vocab, embed_dim).
      tokens_per_step: rows gathered per grid step (multiple of 8).

    Returns:
      Array of shape (B, S, embed_dim), dtype of `table`.
    """
    assert tokens_per_step % 8 == 0
    B, S = token_ids.shape
    V, E = table.shape
    N = B * S
    n_pad = ((N + tokens_per_step - 1) // tokens_per_step) * tokens_per_step

    ids = token_ids.reshape(-1).astype(jnp.int32)
    # PyTorch raises on out-of-range ids; clamp so the DMA gather never reads
    # outside the table.
    ids = jnp.clip(ids, 0, V - 1)
    if n_pad != N:
        ids = jnp.concatenate([ids, jnp.zeros((n_pad - N,), jnp.int32)])

    out = pl.pallas_call(
        _embedding_gather_kernel,
        out_shape=jax.ShapeDtypeStruct((n_pad, E), table.dtype),
        grid_spec=pltpu.PrefetchScalarGridSpec(
            num_scalar_prefetch=1,                    # ids -> SMEM, kept 1-D
            grid=(n_pad // tokens_per_step,),
            in_specs=[pl.BlockSpec(memory_space=pl.ANY)],   # table stays in HBM
            out_specs=pl.BlockSpec((tokens_per_step, E), lambda g, ids: (g, 0)),
            scratch_shapes=[
                pltpu.VMEM((tokens_per_step, E), table.dtype),
                pltpu.SemaphoreType.DMA((tokens_per_step,)),
            ],
        ),
        compiler_params=pltpu.CompilerParams(
            dimension_semantics=("arbitrary",),
        ),
    )(ids, table)

    if n_pad != N:
        out = out[:N]
    return out.reshape(B, S, E)


if __name__ == "__main__":
    # Small, module-consistent shapes.
    batch = 2
    seq_len = 8
    embedding_dimension = 32
    number_of_tokens = 128  # vocab size

    key = jax.random.PRNGKey(0)
    k_table, k_ids = jax.random.split(key)

    # nn.Embedding default init: weight ~ N(0, 1)
    table = jax.random.normal(
        k_table, (number_of_tokens, embedding_dimension), dtype=jnp.float32
    )
    token_ids = jax.random.randint(
        k_ids, (batch, seq_len), minval=0, maxval=number_of_tokens, dtype=jnp.int32
    )

    emb = embedding_forward(token_ids, table)
    emb = jax.block_until_ready(emb)

    # Correctness check against plain-JAX gather (== torch embedding lookup).
    ref = table[token_ids]
    assert emb.shape == (batch, seq_len, embedding_dimension)
    assert jnp.allclose(emb, ref, atol=0.0), "mismatch vs reference gather"

    # TODO(synk): padding_idx / sparse-grad options of nn.Embedding are not
    # modeled (unused by this module's constructor).
    print("KERNEL_OK")
</pallas_src>

<mosaic_0001>
module attributes {stable_mosaic.version = 11 : i64} {
  func.func @_embedding_gather_kernel(%arg0: i32, %arg1: memref<16xi32, #tpu.memory_space<smem>>, %arg2: memref<128x32xf32, #tpu.memory_space<any>>, %arg3: memref<8x32xf32, #tpu.memory_space<vmem>>, %arg4: memref<8x32xf32, #tpu.memory_space<vmem>>, %arg5: memref<8x!tpu.dma_semaphore, #tpu.memory_space<semaphore_mem>>) attributes {dimension_semantics = [#tpu.dimension_semantics<arbitrary>], iteration_bounds = array<i64: 2>, scalar_prefetch = 1 : i64, scratch_operands = 2 : i64, tpu.core_type = #tpu.core_type<tc>, window_params = [{}, {transform_indices = @transform_1, window_bounds = array<i64: 8, 32>}]} {
    %c8_i32 = arith.constant 8 : i32
    %0 = arith.muli %arg0, %c8_i32 : i32
    %c0_i32 = arith.constant 0 : i32
    %1 = arith.addi %0, %c0_i32 : i32
    %2 = arith.index_cast %1 : i32 to index
    %3 = memref.load %arg1[%2] : memref<16xi32, #tpu.memory_space<smem>>
    %c0_i32_0 = arith.constant 0 : i32
    %c0_i32_1 = arith.constant 0 : i32
    %4 = tpu.memref_slice %arg2[%3, %c0_i32_1] : memref<128x32xf32, #tpu.memory_space<any>> -> memref<1x32xf32, #tpu.memory_space<any>>
    %c0_i32_2 = arith.constant 0 : i32
    %c0_i32_3 = arith.constant 0 : i32
    %5 = tpu.memref_slice %arg4[%c0_i32_2, %c0_i32_3] : memref<8x32xf32, #tpu.memory_space<vmem>> -> memref<1x32xf32, #tpu.memory_space<vmem>>
    %6 = tpu.memref_slice %arg5[%c0_i32_0] : memref<8x!tpu.dma_semaphore, #tpu.memory_space<semaphore_mem>> -> memref<1x!tpu.dma_semaphore, #tpu.memory_space<semaphore_mem>>
    %7 = tpu.memref_squeeze %6 : memref<1x!tpu.dma_semaphore, #tpu.memory_space<semaphore_mem>> -> memref<!tpu.dma_semaphore, #tpu.memory_space<semaphore_mem>>
    tpu.enqueue_dma source(%4 : memref<1x32xf32, #tpu.memory_space<any>>) target(%5 : memref<1x32xf32, #tpu.memory_space<vmem>>) target_semaphore(%7 : memref<!tpu.dma_semaphore, #tpu.memory_space<semaphore_mem>>)
    %c1_i32 = arith.constant 1 : i32
    %8 = arith.addi %0, %c1_i32 : i32
    %9 = arith.index_cast %8 : i32 to index
    %10 = memref.load %arg1[%9] : memref<16xi32, #tpu.memory_space<smem>>
    %c1_i32_4 = arith.constant 1 : i32
    %c0_i32_5 = arith.constant 0 : i32
    %11 = tpu.memref_slice %arg2[%10, %c0_i32_5] : memref<128x32xf32, #tpu.memory_space<any>> -> memref<1x32xf32, #tpu.memory_space<any>>
    %c1_i32_6 = arith.constant 1 : i32
    %c0_i32_7 = arith.constant 0 : i32
    %12 = tpu.memref_slice %arg4[%c1_i32_6, %c0_i32_7] : memref<8x32xf32, #tpu.memory_space<vmem>> -> memref<1x32xf32, #tpu.memory_space<vmem>>
    %13 = tpu.memref_slice %arg5[%c1_i32_4] : memref<8x!tpu.dma_semaphore, #tpu.memory_space<semaphore_mem>> -> memref<1x!tpu.dma_semaphore, #tpu.memory_space<semaphore_mem>>
    %14 = tpu.memref_squeeze %13 : memref<1x!tpu.dma_semaphore, #tpu.memory_space<semaphore_mem>> -> memref<!tpu.dma_semaphore, #tpu.memory_space<semaphore_mem>>
    tpu.enqueue_dma source(%11 : memref<1x32xf32, #tpu.memory_space<any>>) target(%12 : memref<1x32xf32, #tpu.memory_space<vmem>>) target_semaphore(%14 : memref<!tpu.dma_semaphore, #tpu.memory_space<semaphore_mem>>)
    %c2_i32 = arith.constant 2 : i32
    %15 = arith.addi %0, %c2_i32 : i32
    %16 = arith.index_cast %15 : i32 to index
    %17 = memref.load %arg1[%16] : memref<16xi32, #tpu.memory_space<smem>>
    %c2_i32_8 = arith.constant 2 : i32
    %c0_i32_9 = arith.constant 0 : i32
    %18 = tpu.memref_slice %arg2[%17, %c0_i32_9] : memref<128x32xf32, #tpu.memory_space<any>> -> memref<1x32xf32, #tpu.memory_space<any>>
    %c2_i32_10 = arith.constant 2 : i32
    %c0_i32_11 = arith.constant 0 : i32
    %19 = tpu.memref_slice %arg4[%c2_i32_10, %c0_i32_11] : memref<8x32xf32, #tpu.memory_space<vmem>> -> memref<1x32xf32, #tpu.memory_space<vmem>>
    %20 = tpu.memref_slice %arg5[%c2_i32_8] : memref<8x!tpu.dma_semaphore, #tpu.memory_space<semaphore_mem>> -> memref<1x!tpu.dma_semaphore, #tpu.memory_space<semaphore_mem>>
    %21 = tpu.memref_squeeze %20 : memref<1x!tpu.dma_semaphore, #tpu.memory_space<semaphore_mem>> -> memref<!tpu.dma_semaphore, #tpu.memory_space<semaphore_mem>>
    tpu.enqueue_dma source(%18 : memref<1x32xf32, #tpu.memory_space<any>>) target(%19 : memref<1x32xf32, #tpu.memory_space<vmem>>) target_semaphore(%21 : memref<!tpu.dma_semaphore, #tpu.memory_space<semaphore_mem>>)
    %c3_i32 = arith.constant 3 : i32
    %22 = arith.addi %0, %c3_i32 : i32
    %23 = arith.index_cast %22 : i32 to index
    %24 = memref.load %arg1[%23] : memref<16xi32, #tpu.memory_space<smem>>
    %c3_i32_12 = arith.constant 3 : i32
    %c0_i32_13 = arith.constant 0 : i32
    %25 = tpu.memref_slice %arg2[%24, %c0_i32_13] : memref<128x32xf32, #tpu.memory_space<any>> -> memref<1x32xf32, #tpu.memory_space<any>>
    %c3_i32_14 = arith.constant 3 : i32
    %c0_i32_15 = arith.constant 0 : i32
    %26 = tpu.memref_slice %arg4[%c3_i32_14, %c0_i32_15] : memref<8x32xf32, #tpu.memory_space<vmem>> -> memref<1x32xf32, #tpu.memory_space<vmem>>
    %27 = tpu.memref_slice %arg5[%c3_i32_12] : memref<8x!tpu.dma_semaphore, #tpu.memory_space<semaphore_mem>> -> memref<1x!tpu.dma_semaphore, #tpu.memory_space<semaphore_mem>>
    %28 = tpu.memref_squeeze %27 : memref<1x!tpu.dma_semaphore, #tpu.memory_space<semaphore_mem>> -> memref<!tpu.dma_semaphore, #tpu.memory_space<semaphore_mem>>
    tpu.enqueue_dma source(%25 : memref<1x32xf32, #tpu.memory_space<any>>) target(%26 : memref<1x32xf32, #tpu.memory_space<vmem>>) target_semaphore(%28 : memref<!tpu.dma_semaphore, #tpu.memory_space<semaphore_mem>>)
    %c4_i32 = arith.constant 4 : i32
    %29 = arith.addi %0, %c4_i32 : i32
    %30 = arith.index_cast %29 : i32 to index
    %31 = memref.load %arg1[%30] : memref<16xi32, #tpu.memory_space<smem>>
    %c4_i32_16 = arith.constant 4 : i32
    %c0_i32_17 = arith.constant 0 : i32
    %32 = tpu.memref_slice %arg2[%31, %c0_i32_17] : memref<128x32xf32, #tpu.memory_space<any>> -> memref<1x32xf32, #tpu.memory_space<any>>
    %c4_i32_18 = arith.constant 4 : i32
    %c0_i32_19 = arith.constant 0 : i32
    %33 = tpu.memref_slice %arg4[%c4_i32_18, %c0_i32_19] : memref<8x32xf32, #tpu.memory_space<vmem>> -> memref<1x32xf32, #tpu.memory_space<vmem>>
    %34 = tpu.memref_slice %arg5[%c4_i32_16] : memref<8x!tpu.dma_semaphore, #tpu.memory_space<semaphore_mem>> -> memref<1x!tpu.dma_semaphore, #tpu.memory_space<semaphore_mem>>
    %35 = tpu.memref_squeeze %34 : memref<1x!tpu.dma_semaphore, #tpu.memory_space<semaphore_mem>> -> memref<!tpu.dma_semaphore, #tpu.memory_space<semaphore_mem>>
    tpu.enqueue_dma source(%32 : memref<1x32xf32, #tpu.memory_space<any>>) target(%33 : memref<1x32xf32, #tpu.memory_space<vmem>>) target_semaphore(%35 : memref<!tpu.dma_semaphore, #tpu.memory_space<semaphore_mem>>)
    %c5_i32 = arith.constant 5 : i32
    %36 = arith.addi %0, %c5_i32 : i32
    %37 = arith.index_cast %36 : i32 to index
    %38 = memref.load %arg1[%37] : memref<16xi32, #tpu.memory_space<smem>>
    %c5_i32_20 = arith.constant 5 : i32
    %c0_i32_21 = arith.constant 0 : i32
    %39 = tpu.memref_slice %arg2[%38, %c0_i32_21] : memref<128x32xf32, #tpu.memory_space<any>> -> memref<1x32xf32, #tpu.memory_space<any>>
    %c5_i32_22 = arith.constant 5 : i32
    %c0_i32_23 = arith.constant 0 : i32
    %40 = tpu.memref_slice %arg4[%c5_i32_22, %c0_i32_23] : memref<8x32xf32, #tpu.memory_space<vmem>> -> memref<1x32xf32, #tpu.memory_space<vmem>>
    %41 = tpu.memref_slice %arg5[%c5_i32_20] : memref<8x!tpu.dma_semaphore, #tpu.memory_space<semaphore_mem>> -> memref<1x!tpu.dma_semaphore, #tpu.memory_space<semaphore_mem>>
    %42 = tpu.memref_squeeze %41 : memref<1x!tpu.dma_semaphore, #tpu.memory_space<semaphore_mem>> -> memref<!tpu.dma_semaphore, #tpu.memory_space<semaphore_mem>>
    tpu.enqueue_dma source(%39 : memref<1x32xf32, #tpu.memory_space<any>>) target(%40 : memref<1x32xf32, #tpu.memory_space<vmem>>) target_semaphore(%42 : memref<!tpu.dma_semaphore, #tpu.memory_space<semaphore_mem>>)
    %c6_i32 = arith.constant 6 : i32
    %43 = arith.addi %0, %c6_i32 : i32
    %44 = arith.index_cast %43 : i32 to index
    %45 = memref.load %arg1[%44] : memref<16xi32, #tpu.memory_space<smem>>
    %c6_i32_24 = arith.constant 6 : i32
    %c0_i32_25 = arith.constant 0 : i32
    %46 = tpu.memref_slice %arg2[%45, %c0_i32_25] : memref<128x32xf32, #tpu.memory_space<any>> -> memref<1x32xf32, #tpu.memory_space<any>>
    %c6_i32_26 = arith.constant 6 : i32
    %c0_i32_27 = arith.constant 0 : i32
    %47 = tpu.memref_slice %arg4[%c6_i32_26, %c0_i32_27] : memref<8x32xf32, #tpu.memory_space<vmem>> -> memref<1x32xf32, #tpu.memory_space<vmem>>
    %48 = tpu.memref_slice %arg5[%c6_i32_24] : memref<8x!tpu.dma_semaphore, #tpu.memory_space<semaphore_mem>> -> memref<1x!tpu.dma_semaphore, #tpu.memory_space<semaphore_mem>>
    %49 = tpu.memref_squeeze %48 : memref<1x!tpu.dma_semaphore, #tpu.memory_space<semaphore_mem>> -> memref<!tpu.dma_semaphore, #tpu.memory_space<semaphore_mem>>
    tpu.enqueue_dma source(%46 : memref<1x32xf32, #tpu.memory_space<any>>) target(%47 : memref<1x32xf32, #tpu.memory_space<vmem>>) target_semaphore(%49 : memref<!tpu.dma_semaphore, #tpu.memory_space<semaphore_mem>>)
    %c7_i32 = arith.constant 7 : i32
    %50 = arith.addi %0, %c7_i32 : i32
    %51 = arith.index_cast %50 : i32 to index
    %52 = memref.load %arg1[%51] : memref<16xi32, #tpu.memory_space<smem>>
    %c7_i32_28 = arith.constant 7 : i32
    %c0_i32_29 = arith.constant 0 : i32
    %53 = tpu.memref_slice %arg2[%52, %c0_i32_29] : memref<128x32xf32, #tpu.memory_space<any>> -> memref<1x32xf32, #tpu.memory_space<any>>
    %c7_i32_30 = arith.constant 7 : i32
    %c0_i32_31 = arith.constant 0 : i32
    %54 = tpu.memref_slice %arg4[%c7_i32_30, %c0_i32_31] : memref<8x32xf32, #tpu.memory_space<vmem>> -> memref<1x32xf32, #tpu.memory_space<vmem>>
    %55 = tpu.memref_slice %arg5[%c7_i32_28] : memref<8x!tpu.dma_semaphore, #tpu.memory_space<semaphore_mem>> -> memref<1x!tpu.dma_semaphore, #tpu.memory_space<semaphore_mem>>
    %56 = tpu.memref_squeeze %55 : memref<1x!tpu.dma_semaphore, #tpu.memory_space<semaphore_mem>> -> memref<!tpu.dma_semaphore, #tpu.memory_space<semaphore_mem>>
    tpu.enqueue_dma source(%53 : memref<1x32xf32, #tpu.memory_space<any>>) target(%54 : memref<1x32xf32, #tpu.memory_space<vmem>>) target_semaphore(%56 : memref<!tpu.dma_semaphore, #tpu.memory_space<semaphore_mem>>)
    %c0_i32_32 = arith.constant 0 : i32
    %c0_i32_33 = arith.constant 0 : i32
    %c0_i32_34 = arith.constant 0 : i32
    %57 = tpu.memref_slice %arg2[%c0_i32_33, %c0_i32_34] : memref<128x32xf32, #tpu.memory_space<any>> -> memref<1x32xf32, #tpu.memory_space<any>>
    %c0_i32_35 = arith.constant 0 : i32
    %c0_i32_36 = arith.constant 0 : i32
    %58 = tpu.memref_slice %arg4[%c0_i32_35, %c0_i32_36] : memref<8x32xf32, #tpu.memory_space<vmem>> -> memref<1x32xf32, #tpu.memory_space<vmem>>
    %59 = tpu.memref_slice %arg5[%c0_i32_32] : memref<8x!tpu.dma_semaphore, #tpu.memory_space<semaphore_mem>> -> memref<1x!tpu.dma_semaphore, #tpu.memory_space<semaphore_mem>>
    %60 = tpu.memref_squeeze %59 : memref<1x!tpu.dma_semaphore, #tpu.memory_space<semaphore_mem>> -> memref<!tpu.dma_semaphore, #tpu.memory_space<semaphore_mem>>
    tpu.wait_dma2 semaphore(%60 : memref<!tpu.dma_semaphore, #tpu.memory_space<semaphore_mem>>) src(%57 : memref<1x32xf32, #tpu.memory_space<any>>) dst(%58 : memref<1x32xf32, #tpu.memory_space<vmem>>)
    %c1_i32_37 = arith.constant 1 : i32
    %c0_i32_38 = arith.constant 0 : i32
    %c0_i32_39 = arith.constant 0 : i32
    %61 = tpu.memref_slice %arg2[%c0_i32_38, %c0_i32_39] : memref<128x32xf32, #tpu.memory_space<any>> -> memref<1x32xf32, #tpu.memory_space<any>>
    %c1_i32_40 = arith.constant 1 : i32
    %c0_i32_41 = arith.constant 0 : i32
    %62 = tpu.memref_slice %arg4[%c1_i32_40, %c0_i32_41] : memref<8x32xf32, #tpu.memory_space<vmem>> -> memref<1x32xf32, #tpu.memory_space<vmem>>
    %63 = tpu.memref_slice %arg5[%c1_i32_37] : memref<8x!tpu.dma_semaphore, #tpu.memory_space<semaphore_mem>> -> memref<1x!tpu.dma_semaphore, #tpu.memory_space<semaphore_mem>>
    %64 = tpu.memref_squeeze %63 : memref<1x!tpu.dma_semaphore, #tpu.memory_space<semaphore_mem>> -> memref<!tpu.dma_semaphore, #tpu.memory_space<semaphore_mem>>
    tpu.wait_dma2 semaphore(%64 : memref<!tpu.dma_semaphore, #tpu.memory_space<semaphore_mem>>) src(%61 : memref<1x32xf32, #tpu.memory_space<any>>) dst(%62 : memref<1x32xf32, #tpu.memory_space<vmem>>)
    %c2_i32_42 = arith.constant 2 : i32
    %c0_i32_43 = arith.constant 0 : i32
    %c0_i32_44 = arith.constant 0 : i32
    %65 = tpu.memref_slice %arg2[%c0_i32_43, %c0_i32_44] : memref<128x32xf32, #tpu.memory_space<any>> -> memref<1x32xf32, #tpu.memory_space<any>>
    %c2_i32_45 = arith.constant 2 : i32
    %c0_i32_46 = arith.constant 0 : i32
    %66 = tpu.memref_slice %arg4[%c2_i32_45, %c0_i32_46] : memref<8x32xf32, #tpu.memory_space<vmem>> -> memref<1x32xf32, #tpu.memory_space<vmem>>
    %67 = tpu.memref_slice %arg5[%c2_i32_42] : memref<8x!tpu.dma_semaphore, #tpu.memory_space<semaphore_mem>> -> memref<1x!tpu.dma_semaphore, #tpu.memory_space<semaphore_mem>>
    %68 = tpu.memref_squeeze %67 : memref<1x!tpu.dma_semaphore, #tpu.memory_space<semaphore_mem>> -> memref<!tpu.dma_semaphore, #tpu.memory_space<semaphore_mem>>
    tpu.wait_dma2 semaphore(%68 : memref<!tpu.dma_semaphore, #tpu.memory_space<semaphore_mem>>) src(%65 : memref<1x32xf32, #tpu.memory_space<any>>) dst(%66 : memref<1x32xf32, #tpu.memory_space<vmem>>)
    %c3_i32_47 = arith.constant 3 : i32
    %c0_i32_48 = arith.constant 0 : i32
    %c0_i32_49 = arith.constant 0 : i32
    %69 = tpu.memref_slice %arg2[%c0_i32_48, %c0_i32_49] : memref<128x32xf32, #tpu.memory_space<any>> -> memref<1x32xf32, #tpu.memory_space<any>>
    %c3_i32_50 = arith.constant 3 : i32
    %c0_i32_51 = arith.constant 0 : i32
    %70 = tpu.memref_slice %arg4[%c3_i32_50, %c0_i32_51] : memref<8x32xf32, #tpu.memory_space<vmem>> -> memref<1x32xf32, #tpu.memory_space<vmem>>
    %71 = tpu.memref_slice %arg5[%c3_i32_47] : memref<8x!tpu.dma_semaphore, #tpu.memory_space<semaphore_mem>> -> memref<1x!tpu.dma_semaphore, #tpu.memory_space<semaphore_mem>>
    %72 = tpu.memref_squeeze %71 : memref<1x!tpu.dma_semaphore, #tpu.memory_space<semaphore_mem>> -> memref<!tpu.dma_semaphore, #tpu.memory_space<semaphore_mem>>
    tpu.wait_dma2 semaphore(%72 : memref<!tpu.dma_semaphore, #tpu.memory_space<semaphore_mem>>) src(%69 : memref<1x32xf32, #tpu.memory_space<any>>) dst(%70 : memref<1x32xf32, #tpu.memory_space<vmem>>)
    %c4_i32_52 = arith.constant 4 : i32
    %c0_i32_53 = arith.constant 0 : i32
    %c0_i32_54 = arith.constant 0 : i32
    %73 = tpu.memref_slice %arg2[%c0_i32_53, %c0_i32_54] : memref<128x32xf32, #tpu.memory_space<any>> -> memref<1x32xf32, #tpu.memory_space<any>>
    %c4_i32_55 = arith.constant 4 : i32
    %c0_i32_56 = arith.constant 0 : i32
    %74 = tpu.memref_slice %arg4[%c4_i32_55, %c0_i32_56] : memref<8x32xf32, #tpu.memory_space<vmem>> -> memref<1x32xf32, #tpu.memory_space<vmem>>
    %75 = tpu.memref_slice %arg5[%c4_i32_52] : memref<8x!tpu.dma_semaphore, #tpu.memory_space<semaphore_mem>> -> memref<1x!tpu.dma_semaphore, #tpu.memory_space<semaphore_mem>>
    %76 = tpu.memref_squeeze %75 : memref<1x!tpu.dma_semaphore, #tpu.memory_space<semaphore_mem>> -> memref<!tpu.dma_semaphore, #tpu.memory_space<semaphore_mem>>
    tpu.wait_dma2 semaphore(%76 : memref<!tpu.dma_semaphore, #tpu.memory_space<semaphore_mem>>) src(%73 : memref<1x32xf32, #tpu.memory_space<any>>) dst(%74 : memref<1x32xf32, #tpu.memory_space<vmem>>)
    %c5_i32_57 = arith.constant 5 : i32
    %c0_i32_58 = arith.constant 0 : i32
    %c0_i32_59 = arith.constant 0 : i32
    %77 = tpu.memref_slice %arg2[%c0_i32_58, %c0_i32_59] : memref<128x32xf32, #tpu.memory_space<any>> -> memref<1x32xf32, #tpu.memory_space<any>>
    %c5_i32_60 = arith.constant 5 : i32
    %c0_i32_61 = arith.constant 0 : i32
    %78 = tpu.memref_slice %arg4[%c5_i32_60, %c0_i32_61] : memref<8x32xf32, #tpu.memory_space<vmem>> -> memref<1x32xf32, #tpu.memory_space<vmem>>
    %79 = tpu.memref_slice %arg5[%c5_i32_57] : memref<8x!tpu.dma_semaphore, #tpu.memory_space<semaphore_mem>> -> memref<1x!tpu.dma_semaphore, #tpu.memory_space<semaphore_mem>>
    %80 = tpu.memref_squeeze %79 : memref<1x!tpu.dma_semaphore, #tpu.memory_space<semaphore_mem>> -> memref<!tpu.dma_semaphore, #tpu.memory_space<semaphore_mem>>
    tpu.wait_dma2 semaphore(%80 : memref<!tpu.dma_semaphore, #tpu.memory_space<semaphore_mem>>) src(%77 : memref<1x32xf32, #tpu.memory_space<any>>) dst(%78 : memref<1x32xf32, #tpu.memory_space<vmem>>)
    %c6_i32_62 = arith.constant 6 : i32
    %c0_i32_63 = arith.constant 0 : i32
    %c0_i32_64 = arith.constant 0 : i32
    %81 = tpu.memref_slice %arg2[%c0_i32_63, %c0_i32_64] : memref<128x32xf32, #tpu.memory_space<any>> -> memref<1x32xf32, #tpu.memory_space<any>>
    %c6_i32_65 = arith.constant 6 : i32
    %c0_i32_66 = arith.constant 0 : i32
    %82 = tpu.memref_slice %arg4[%c6_i32_65, %c0_i32_66] : memref<8x32xf32, #tpu.memory_space<vmem>> -> memref<1x32xf32, #tpu.memory_space<vmem>>
    %83 = tpu.memref_slice %arg5[%c6_i32_62] : memref<8x!tpu.dma_semaphore, #tpu.memory_space<semaphore_mem>> -> memref<1x!tpu.dma_semaphore, #tpu.memory_space<semaphore_mem>>
    %84 = tpu.memref_squeeze %83 : memref<1x!tpu.dma_semaphore, #tpu.memory_space<semaphore_mem>> -> memref<!tpu.dma_semaphore, #tpu.memory_space<semaphore_mem>>
    tpu.wait_dma2 semaphore(%84 : memref<!tpu.dma_semaphore, #tpu.memory_space<semaphore_mem>>) src(%81 : memref<1x32xf32, #tpu.memory_space<any>>) dst(%82 : memref<1x32xf32, #tpu.memory_space<vmem>>)
    %c7_i32_67 = arith.constant 7 : i32
    %c0_i32_68 = arith.constant 0 : i32
    %c0_i32_69 = arith.constant 0 : i32
    %85 = tpu.memref_slice %arg2[%c0_i32_68, %c0_i32_69] : memref<128x32xf32, #tpu.memory_space<any>> -> memref<1x32xf32, #tpu.memory_space<any>>
    %c7_i32_70 = arith.constant 7 : i32
    %c0_i32_71 = arith.constant 0 : i32
    %86 = tpu.memref_slice %arg4[%c7_i32_70, %c0_i32_71] : memref<8x32xf32, #tpu.memory_space<vmem>> -> memref<1x32xf32, #tpu.memory_space<vmem>>
    %87 = tpu.memref_slice %arg5[%c7_i32_67] : memref<8x!tpu.dma_semaphore, #tpu.memory_space<semaphore_mem>> -> memref<1x!tpu.dma_semaphore, #tpu.memory_space<semaphore_mem>>
    %88 = tpu.memref_squeeze %87 : memref<1x!tpu.dma_semaphore, #tpu.memory_space<semaphore_mem>> -> memref<!tpu.dma_semaphore, #tpu.memory_space<semaphore_mem>>
    tpu.wait_dma2 semaphore(%88 : memref<!tpu.dma_semaphore, #tpu.memory_space<semaphore_mem>>) src(%85 : memref<1x32xf32, #tpu.memory_space<any>>) dst(%86 : memref<1x32xf32, #tpu.memory_space<vmem>>)
    %c0 = arith.constant 0 : index
    %c0_72 = arith.constant 0 : index
    %89 = vector.load %arg4[%c0, %c0_72] : memref<8x32xf32, #tpu.memory_space<vmem>>, vector<8x32xf32>
    %c0_73 = arith.constant 0 : index
    %c0_74 = arith.constant 0 : index
    %90 = vector.load %arg3[%c0_73, %c0_74] : memref<8x32xf32, #tpu.memory_space<vmem>>, vector<8x32xf32>
    tpu.vector_store %arg3[%c0_73, %c0_74], %89 {strides = array<i32>} : memref<8x32xf32, #tpu.memory_space<vmem>>, vector<8x32xf32>,
    return
  }
  func.func @transform_1(%arg0: i32, %arg1: memref<16xi32, #tpu.memory_space<smem>>) -> (i32, i32) {
    %c0_i32 = arith.constant 0 : i32
    %c0_i32_0 = arith.constant 0 : i32
    return %arg0, %c0_i32 : i32, i32
  }
}

</mosaic_0001>

<bundles_post_ra>
// kernel: tpu_custom_call.1
= control target key start
LH: loop header
LB: loop body
LE: loop exit
PB: predicated region body
PF: predicated region fallthrough
CT: control target
= control target key end

     0   :  { %s953_s0 = inlined_call_operand.vmem [shape: s32[16], index: 0, kind: input, shape index: {}]   ;;  %s954_s1 = inlined_call_operand.vmem [shape: f32[128,32], index: 1, kind: input, shape index: {}]   ;;  %s955_s2 = inlined_call_operand.hbm [shape: f32[16,32], index: 2, kind: output, shape index: {}]  }
   0x1   :  { %s7_s11 = sshll.u32 %s953_s0, 4  ;;  %s8_s11 = int_to_ptr.vmem [resolvable:$true] %s7_s11 }
   0x2   :  { %s720_s12 = scalar_lea.vmem %s8_s11, 16  ;;  %p725_p1 = scmp.lt.s32.totalorder %s8_s11, %s8_s11 }
   0x3   :  { %p721_p0 = scmp.ne.s32.totalorder %s8_s11, %s720_s12  ;;  %p726_p2 = scmp.lt.s32.totalorder %s720_s12, %s720_s12 }
   0x5   :  { %p727_p3 = por %p726_p2, %p725_p1 }
   0x7   :  { %p728_p4 = pnand %p727_p3, %p721_p0 }
   0x9   :  { %731 = shalt.err (!%p728_p4)  }
   0xa   :  { %s806_s13 = smov [#allocation5]  }
   0xb   :  { %10 = dma.vmem_to_smem %s8_s11, 16, %s806_s13, [#allocation4] }
   0xc   :  { %772 = dma.done.wait [#allocation4], 16 }
   0xd   :  { %773 = vsyncadd [#allocation4], 4294967280 }
   0xe   :  { %12 = sfence }
   0xf   :  { %13 = vsyncpa [#allocation7], 0 }
  0x10   :  { %15 = vsyncpa [#allocation7 + $0x1], 0  ;;  %s826_s14 = smov 0   ;;  %s828_s15 = smov 0  }
  0x11   :  { %s830_s0 = smov 0  }
  0x12 LB: > { %s671_s16 = sadd.s32 4294967295, %s804_s0   ;;  %s843_s17 = sadd.s32 1, %s804_s0   ;;  %s804_s0 = sphi %s830_s0, %s960_s0   ;;  %s800_s15 = sphi %s828_s15, %s959_s15   ;;  %s796_s14 = sphi %s826_s14, %s958_s14  }
  0x13   : > { %s24_s18 = ssub.s32 %s804_s0, %s843_s17  ;;  %s27_s19 = sadd.s32 1, %s800_s15 }
  0x14   : > { %p25_p5 = scmp.eq.s32.totalorder %s24_s18, 0  ;;  %p672_p6 = scmp.ne.s32.totalorder %s24_s18, 0 }
  0x15   : > { %p31_p7 = scmp.eq.s32.totalorder %s804_s0, 1  ;;  %p36_p8 = scmp.ne.s32.totalorder %s800_s15, %s796_s14 }
  0x16   : > { %s852_s20 = scalar_select %p25_p5, %s800_s15, %s27_s19  }
  0x17   : > { %p854_p9 = por %p672_p6, %p31_p7  ;;  %p37_p10 = scmp.eq.s32.totalorder %s671_s16, 1 }
  0x18   : > { %p673_p12 = scmp.ge.s32.totalorder %s804_s0, 2 }
  0x19   : > { %p858_p11 = por %p37_p10, %p36_p8  ;;  %s51_s23 = sand.u32 (!%p673_p12), 1, %s800_s15  }
  0x1a   : > { %46 = sbr.rel (%p673_p12) target bundleno = 146 (0x92), region = 12  ;;  %s865_s24 = sshll.u32 (!%p673_p12), %s804_s0, 3 }
  0x1b   : > { %s869_s25 = sshll.u32 (!%p673_p12), %s51_s23, 3  ;;  %s55_s26 = sld [smem:[#allocation5 + %s865_s24]] (!%p673_p12) }
  0x1c   : > { %s53_s30 = scalar_lea.vmem (!%p673_p12), [#allocation6], %s869_s25 }
  0x21   : > { %s56_s29 = scalar_lea.vmem %s954_s1, %s55_s26 }
  0x22   : > { %v74_v0 = vld [vmem:[%s56_s29] sm:$0x1] }
  0x23   : > { %75 = vst [vmem:[#allocation2] sm:$0x1] %v74_v0 }
  0x24   : > { %100 = vsyncadd [#allocation3], 16  ;;  %s101_s3 = sadd.s32 1, %s865_s24 }
  0x25   : > { %s102_s4 = sld [smem:[#allocation5 + %s101_s3]] }
  0x2b   : > { %s103_s7 = scalar_lea.vmem %s954_s1, %s102_s4 }
  0x2c   : > { %v123_v1 = vld [vmem:[%s103_s7] sm:$0x1] }
  0x2d   : > { %124 = vst [vmem:[#allocation2 + $0x1] sm:$0x1] %v123_v1 }
  0x2e   : > { %149 = vsyncadd [#allocation3 + $0x1], 16  ;;  %s150_s8 = sadd.s32 2, %s865_s24 }
  0x2f   : > { %s151_s9 = sld [smem:[#allocation5 + %s150_s8]] }
  0x35   : > { %s152_s12 = scalar_lea.vmem %s954_s1, %s151_s9 }
  0x36   : > { %v172_v2 = vld [vmem:[%s152_s12] sm:$0x1] }
  0x37   : > { %173 = vst [vmem:[#allocation2 + $0x2] sm:$0x1] %v172_v2 }
  0x38   : > { %198 = vsyncadd [#allocation3 + $0x2], 16  ;;  %s199_s13 = sadd.s32 3, %s865_s24 }
  0x39   : > { %s200_s16 = sld [smem:[#allocation5 + %s199_s13]] }
  0x3f   : > { %s201_s26 = scalar_lea.vmem %s954_s1, %s200_s16 }
  0x40   : > { %v221_v3 = vld [vmem:[%s201_s26] sm:$0x1] }
  0x41   : > { %222 = vst [vmem:[#allocation2 + $0x3] sm:$0x1] %v221_v3 }
  0x42   : > { %247 = vsyncadd [#allocation3 + $0x3], 16  ;;  %s248_s27 = sadd.s32 4, %s865_s24 }
  0x43   : > { %s249_s28 = sld [smem:[#allocation5 + %s248_s27]] }
  0x49   : > { %s250_s4 = scalar_lea.vmem %s954_s1, %s249_s28 }
  0x4a   : > { %v270_v4 = vld [vmem:[%s250_s4] sm:$0x1] }
  0x4b   : > { %271 = vst [vmem:[#allocation2 + $0x4] sm:$0x1] %v270_v4 }
  0x4c   : > { %296 = vsyncadd [#allocation3 + $0x4], 16  ;;  %s297_s5 = sadd.s32 5, %s865_s24 }
  0x4d   : > { %s298_s6 = sld [smem:[#allocation5 + %s297_s5]] }
  0x53   : > { %s299_s9 = scalar_lea.vmem %s954_s1, %s298_s6 }
  0x54   : > { %v319_v5 = vld [vmem:[%s299_s9] sm:$0x1] }
  0x55   : > { %320 = vst [vmem:[#allocation2 + $0x5] sm:$0x1] %v319_v5 }
  0x56   : > { %345 = vsyncadd [#allocation3 + $0x5], 16  ;;  %s346_s10 = sadd.s32 6, %s865_s24 }
  0x57   : > { %s347_s11 = sld [smem:[#allocation5 + %s346_s10]] }
  0x5d   : > { %s348_s16 = scalar_lea.vmem %s954_s1, %s347_s11 }
  0x5e   : > { %v368_v6 = vld [vmem:[%s348_s16] sm:$0x1] }
  0x5f   : > { %369 = vst [vmem:[#allocation2 + $0x6] sm:$0x1] %v368_v6 }
  0x60   : > { %394 = vsyncadd [#allocation3 + $0x6], 16  ;;  %s395_s18 = sadd.s32 7, %s865_s24 }
  0x61   : > { %s396_s19 = sld [smem:[#allocation5 + %s395_s18]] }
  0x67   : > { %s397_s28 = scalar_lea.vmem %s954_s1, %s396_s19 }
  0x68   : > { %v417_v7 = vld [vmem:[%s397_s28] sm:$0x1] }
  0x69   : > { %418 = vst [vmem:[#allocation2 + $0x7] sm:$0x1] %v417_v7 }
  0x6a   : > { %443 = vsyncadd [#allocation3 + $0x7], 16 }
  0x6b   : > { %774 = dma.done.wait [#allocation3], 16 }
  0x6c   : > { %775 = vsyncadd [#allocation3], 4294967280 }
  0x6d   : > { %776 = dma.done.wait [#allocation3 + $0x1], 16 }
  0x6e   : > { %777 = vsyncadd [#allocation3 + $0x1], 4294967280 }
  0x6f   : > { %778 = dma.done.wait [#allocation3 + $0x2], 16 }
  0x70   : > { %779 = vsyncadd [#allocation3 + $0x2], 4294967280 }
  0x71   : > { %780 = dma.done.wait [#allocation3 + $0x3], 16 }
  0x72   : > { %781 = vsyncadd [#allocation3 + $0x3], 4294967280 }
  0x73   : > { %782 = dma.done.wait [#allocation3 + $0x4], 16 }
  0x74   : > { %783 = vsyncadd [#allocation3 + $0x4], 4294967280 }
  0x75   : > { %784 = dma.done.wait [#allocation3 + $0x5], 16 }
  0x76   : > { %785 = vsyncadd [#allocation3 + $0x5], 4294967280 }
  0x77   : > { %786 = dma.done.wait [#allocation3 + $0x6], 16 }
  0x78   : > { %787 = vsyncadd [#allocation3 + $0x6], 4294967280 }
  0x79   : > { %788 = dma.done.wait [#allocation3 + $0x7], 16 }
  0x7a   : > { %789 = vsyncadd [#allocation3 + $0x7], 4294967280  ;;  %s677_s24 = sshll.u32 %s804_s0, 7  ;;  %s478_s29 = sshll.u32 %s53_s30, 4  ;;  %vm462_vm0 = vcmask 261120   ;;  %v461_v8 = vld [vmem:[#allocation2] sm:$0xff]  ;;  %s912_s29 = int_to_ptr.vmem [resolvable:$true] %s478_s29 }
  0x7b   : > { %s910_s5 = scalar_lea.hbm %s955_s2, %s677_s24  ;;  %463 = vst.msk [vmem:[%s53_s30] sm:$0xff] %vm462_vm0, %v461_v8  ;;  %s465_s6 = scalar_lea.sflag [#allocation7], %s51_s23 }
  0x7c   : > { %s732_s7 = scalar_lea.vmem %s912_s29, 128  ;;  %s807_s8 = smov [#allocation6]  }
  0x7d   : > { %p733_p13 = scmp.ne.s32.totalorder %s912_s29, %s732_s7  ;;  %s736_s9 = sshll.u32 %s807_s8, 4  ;;  %s737_s9 = int_to_ptr.vmem [resolvable:$false] %s736_s9 }
  0x7e   : > { %s738_s10 = scalar_lea.vmem %s737_s9, 256  ;;  %p739_p2 = scmp.lt.s32.totalorder %s912_s29, %s737_s9 }
  0x7f   : > { %p734_p0 = pnand %p733_p13, %p854_p9  ;;  %p740_p3 = scmp.lt.s32.totalorder %s738_s10, %s732_s7 }
  0x81   : > { %p735_p1 = pneg %p734_p0  ;;  %p741_p4 = por %p740_p3, %p739_p2 }
  0x83   : > { %p742_p5 = pnand %p741_p4, %p735_p1 }
  0x85   : > { %745 = shalt.err (!%p742_p5)
}
  0x86   : > { %s746_s23 = scalar_lea.hbm %s910_s5, 128  ;;  %s750_s11 = scalar_lea.hbm %s955_s2, 256 }
  0x87   : > { %p747_p6 = scmp.ne.s32.totalorder %s910_s5, %s746_s23  ;;  %p751_p10 = scmp.lt.u32.totalorder %s910_s5, %s955_s2 }
  0x88   : > { %p752_p12 = scmp.lt.u32.totalorder %s750_s11, %s746_s23  ;;  %p754_p0 = scmp.lt.u32.totalorder %s746_s23, %s910_s5 }
  0x89   : > { %p748_p7 = pnand %p747_p6, %p854_p9 }
  0x8a   : > { %p753_p13 = por %p752_p12, %p751_p10 }
  0x8b   : > { %p749_p8 = pneg %p748_p7 }
  0x8c   : > { %p755_p1 = por %p754_p0, %p753_p13 }
  0x8e   : > { %p756_p2 = pnand %p755_p1, %p749_p8 }
  0x90   : > { %759 = shalt.err (!%p756_p2)
}
  0x91   : > { %688 = dma.vmem_to_hbm [thread:$0]  (%p854_p9), %s912_s29, 128, %s910_s5, %s465_s6  }
  0x92 PF: > { %p694_p3 = scmp.ge.s32.totalorder %s804_s0, 1  ;;  %s490_s16 = sand.u32 1, %s796_s14  }
  0x93   : > { %s491_s18 = scalar_lea.sflag [#allocation7], %s490_s16 }
  0x94   : > { %p691_p4 = pnand %p694_p3, %p858_p11 }
  0x96   : > { %791 = dma.done.wait (!%p691_p4), %s491_s18, 128  }
  0x97   : > { %793 = vsyncadd (!%p691_p4), %s491_s18, 4294967168  ;;  %p18_p5 = scmp.ge.s32.totalorder %s843_s17, 3   ;;  %s958_s14 = smov %s800_s15 }
  0x98   : > { %s959_s15 = smov %s852_s20  ;;  %s960_s0 = smov %s843_s17 }
  0x99   :  { %20 = sbr.rel (!%p18_p5) target bundleno = 18 (0x12), region = 393 }
  0xa0   :  { %496 = vsyncpa [#allocation7], 1 }
  0xa1   :  { %498 = vsyncpa [#allocation7 + $0x1], 1 }
  0xa2   :  { %499 = vsyncmov [#allocation3] }
  0xa5   :  { %s500_s0 = vpop.sfrf %499 }
  0xa6   :  { %p680_p9 = scmp.ne.s32.totalorder %s500_s0, 0 }
  0xa8   :  { %504 = shalt.err (%p680_p9)  }
  0xa9   :  { %506 = vsyncmov [#allocation3 + $0x1] }
  0xac   :  { %s507_s21 = vpop.sfrf %506 }
  0xad   :  { %p681_p11 = scmp.ne.s32.totalorder %s507_s21, 0 }
  0xaf   :  { %511 = shalt.err (%p681_p11)  }
  0xb0   :  { %513 = vsyncmov [#allocation3 + $0x2] }
  0xb3   :  { %s514_s22 = vpop.sfrf %513 }
  0xb4   :  { %p682_p6 = scmp.ne.s32.totalorder %s514_s22, 0 }
  0xb6   :  { %518 = shalt.err (%p682_p6)  }
  0xb7   :  { %520 = vsyncmov [#allocation3 + $0x3] }
  0xba   :  { %s521_s19 = vpop.sfrf %520 }
  0xbb   :  { %p683_p7 = scmp.ne.s32.totalorder %s521_s19, 0 }
  0xbd   :  { %525 = shalt.err (%p683_p7)  }
  0xbe   :  { %527 = vsyncmov [#allocation3 + $0x4] }
  0xc1   :  { %s528_s17 = vpop.sfrf %527 }
  0xc2   :  { %p684_p8 = scmp.ne.s32.totalorder %s528_s17, 0 }
  0xc4   :  { %532 = shalt.err (%p684_p8)  }
  0xc5   :  { %534 = vsyncmov [#allocation3 + $0x5] }
  0xc8   :  { %s535_s1 = vpop.sfrf %534 }
  0xc9   :  { %p685_p10 = scmp.ne.s32.totalorder %s535_s1, 0 }
  0xcb   :  { %539 = shalt.err (%p685_p10)  }
  0xcc   :  { %541 = vsyncmov [#allocation3 + $0x6] }
  0xcf   :  { %s542_s2 = vpop.sfrf %541 }
  0xd0   :  { %p686_p12 = scmp.ne.s32.totalorder %s542_s2, 0 }
  0xd2   :  { %546 = shalt.err (%p686_p12)  }
  0xd3   :  { %548 = vsyncmov [#allocation3 + $0x7] }
  0xd6   :  { %s549_s14 = vpop.sfrf %548 }
  0xd7   :  { %p687_p13 = scmp.ne.s32.totalorder %s549_s14, 0 }
  0xd9   :  { %553 = shalt.err (%p687_p13)  }

</bundles_post_ra>
